<compile_context>
chip_gen: v7x
topology: tpu7x:2x2x1
jax: 0.10.0
libtpu: 0.0.40
codegen_flags: <defaults>
</compile_context>

<pallas_src>
import functools

import jax
import jax.numpy as jnp
from jax.experimental import pallas as pl
from jax.experimental.pallas import tpu as pltpu


def temporal_block_kernel(x_ref, t_ref, w1_ref, b1_ref, w2_ref, b2_ref,
                          wd_ref, bd_ref, out_ref,
                          *, k, dilation, pad, compute_dtype):
    """One lane-dense slab of packed batch elements per grid step.

    x_ref : (C_in, cols)       cols = whole batch elements on the lane axis
    t_ref : (1, cols) int32    time-within-element of every column
    w1_ref: (k, C_out, C_in)   conv1 weight, one (C_out, C_in) matrix per tap
    w2_ref: (k, C_out, C_out)  conv2 weight
    wd_ref: (C_out, C_in)      1x1 downsample
    b*_ref: (C_out, 1)         biases (broadcast over columns)
    out_ref: (C_out, cols)
    """
    cd = compute_dtype
    t = t_ref[...]                                    # hoisted once, reused by both convs
    shifts = [pad - j * dilation for j in range(k)]   # causal right-shift of tap j
    masks = [None if s == 0 else (t >= s) for s in shifts]

    def causal_dilated_conv(a, w_ref, b_ref):
        # k accumulating MXU matmuls into one f32 accumulator
        # (no sublane-misaligned tap concatenation).
        acc = None
        for j, (s, m) in enumerate(zip(shifts, masks)):
            if s == 0:
                tap = a
            else:
                # Lane roll (XLU slot) + zero lanes whose causal history does
                # not exist (t < s).  The mask also kills anything the circular
                # roll wrapped across element / padding boundaries == Chomp1d.
                tap = jnp.where(m, pltpu.roll(a, shift=s, axis=1), 0.0)
            y = jnp.dot(w_ref[j].astype(cd), tap.astype(cd),
                        preferred_element_type=jnp.float32)
            acc = y if acc is None else acc + y
        return acc + b_ref[...]

    x = x_ref[...]                                                  # (C_in, cols)
    h1 = jnp.maximum(causal_dilated_conv(x, w1_ref, b1_ref), 0.0)   # conv1+chomp+relu
    # TODO(synk): dropout1/dropout2 are identity in eval mode; training-mode dropout not implemented.
    h2 = jnp.maximum(causal_dilated_conv(h1, w2_ref, b2_ref), 0.0)  # conv2+chomp+relu
    res = jnp.dot(wd_ref[...].astype(cd), x.astype(cd),
                  preferred_element_type=jnp.float32) + bd_ref[...]
    out_ref[...] = jnp.maximum(h2 + res, 0.0).astype(out_ref.dtype)


def _choose_packing(n, l, max_cols=16 * 1024):
    """Return (grid_steps, padded columns per step)."""
    total = n * l
    if total <= max_cols:
        # Whole batch in one step; pad columns to a multiple of 128 so every
        # store is an unmasked full-lane write.
        return 1, -(-total // 128) * 128
    # Multi-step: each block must hold whole elements (so a tap's causal
    # history never crosses a block boundary) and be 128-lane aligned.
    for nb in range(n, 0, -1):
        if n % nb == 0 and nb * l <= max_cols and (nb * l) % 128 == 0:
            return n // nb, nb * l
    # TODO(synk): no aligned whole-element split found; fall back to one
    # (possibly VMEM-heavy) step rather than emitting misaligned blocks.
    return 1, -(-total // 128) * 128


def temporal_block(x_ncl, params, *, kernel_size, dilation, padding,
                   use_bf16_matmul=False):
    """x_ncl: (N, C_in, L) float32 -> (N, C_out, L) float32."""
    N, C_in, L = x_ncl.shape
    k, C_out, _ = params['w1'].shape
    assert k == kernel_size
    assert padding == (kernel_size - 1) * dilation, \
        "STAGGCN TemporalBlock uses causal padding = (k-1)*dilation"

    steps, cols = _choose_packing(N, L)
    total_padded = steps * cols

    # Lane-dense packing: one wrapper transpose (a single HBM pass) so the time
    # axis of every batch element sits on the 128-lane axis of one wide slab.
    x_packed = jnp.transpose(x_ncl, (1, 0, 2)).reshape(C_in, N * L)
    if total_padded != N * L:
        x_packed = jnp.pad(x_packed, ((0, 0), (0, total_padded - N * L)))
    # Time-within-element of every packed column (drives the causal masks).
    t_pos = (jnp.arange(total_padded, dtype=jnp.int32) % L).reshape(1, total_padded)

    kern = functools.partial(
        temporal_block_kernel, k=k, dilation=dilation, pad=padding,
        compute_dtype=jnp.bfloat16 if use_bf16_matmul else jnp.float32)

    def const_spec(shape):
        # full-array block, constant index_map -> stays resident in VMEM
        return pl.BlockSpec(shape, lambda n: (0,) * len(shape))

    out_packed = pl.pallas_call(
        kern,
        out_shape=jax.ShapeDtypeStruct((C_out, total_padded), jnp.float32),
        grid=(steps,),
        in_specs=[
            pl.BlockSpec((C_in, cols), lambda n: (0, n)),   # x slab (lane-dense)
            pl.BlockSpec((1, cols), lambda n: (0, n)),      # per-column time index
            const_spec((k, C_out, C_in)),                   # w1 (per-tap matrices)
            const_spec((C_out, 1)),                         # b1
            const_spec((k, C_out, C_out)),                  # w2
            const_spec((C_out, 1)),                         # b2
            const_spec((C_out, C_in)),                      # wd (1x1 downsample)
            const_spec((C_out, 1)),                         # bd
        ],
        out_specs=pl.BlockSpec((C_out, cols), lambda n: (0, n)),
        compiler_params=pltpu.CompilerParams(
            # "parallel" lets the scheduler shard the step axis; on v7x switch
            # to pltpu.CORE_PARALLEL to force the 2-TensorCore split.
            dimension_semantics=("parallel",),
            vmem_limit_bytes=32 * 1024 * 1024,   # safe on v5e/v6e and v7x's 64 MiB
        ),
    )(x_packed, t_pos, params['w1'], params['b1'], params['w2'], params['b2'],
      params['wd'], params['bd'])

    out = out_packed[:, :N * L].reshape(C_out, N, L)
    return jnp.transpose(out, (1, 0, 2))


def make_params(key, c_in, c_out, k):
    """Deterministic synthetic params; weight_norm reparam w = g * v / ||v||_row."""
    ks = jax.random.split(key, 8)

    def wnorm(v, g):
        n = jnp.linalg.norm(v.reshape(v.shape[0], -1), axis=1)
        return g[:, None, None] * v / n[:, None, None]

    v1 = 0.01 * jax.random.normal(ks[0], (c_out, c_in, k), jnp.float32)
    g1 = 1.0 + 0.1 * jax.random.normal(ks[1], (c_out,), jnp.float32)
    w1_oik = wnorm(v1, g1)
    b1 = 0.01 * jax.random.normal(ks[2], (c_out,), jnp.float32)

    v2 = 0.01 * jax.random.normal(ks[3], (c_out, c_out, k), jnp.float32)
    g2 = 1.0 + 0.1 * jax.random.normal(ks[4], (c_out,), jnp.float32)
    w2_oik = wnorm(v2, g2)
    b2 = 0.01 * jax.random.normal(ks[5], (c_out,), jnp.float32)

    wd_oik = 0.01 * jax.random.normal(ks[6], (c_out, c_in, 1), jnp.float32)
    bd = 0.01 * jax.random.normal(ks[7], (c_out,), jnp.float32)

    return {
        # kernel layout: taps on the leading axis, one (C_out, C_in) matrix per tap
        'w1': jnp.transpose(w1_oik, (2, 0, 1)), 'b1': b1.reshape(c_out, 1),
        'w2': jnp.transpose(w2_oik, (2, 0, 1)), 'b2': b2.reshape(c_out, 1),
        'wd': wd_oik[:, :, 0],                  'bd': bd.reshape(c_out, 1),
        # PyTorch-layout copies for the plain-JAX reference check
        'w1_oik': w1_oik, 'b1v': b1,
        'w2_oik': w2_oik, 'b2v': b2,
        'wd_oik': wd_oik, 'bdv': bd,
    }


def ref_temporal_block(x_ncl, p, *, kernel_size, dilation, padding):
    """Plain-JAX reference mirroring the PyTorch forward (eval mode)."""
    def conv1d(x, w, b, pad, dil):
        y = jax.lax.conv_general_dilated(
            x, w, window_strides=(1,), padding=[(pad, pad)],
            rhs_dilation=(dil,), dimension_numbers=('NCH', 'OIH', 'NCH'))
        return y + b[None, :, None]

    out = conv1d(x_ncl, p['w1_oik'], p['b1v'], padding, dilation)
    out = out[:, :, :-padding] if padding > 0 else out           # Chomp1d
    out = jnp.maximum(out, 0.0)                                  # ReLU (dropout = id)
    out = conv1d(out, p['w2_oik'], p['b2v'], padding, dilation)
    out = out[:, :, :-padding] if padding > 0 else out           # Chomp1d
    out = jnp.maximum(out, 0.0)
    res = conv1d(x_ncl, p['wd_oik'], p['bdv'], 0, 1)             # 1x1 downsample
    return jnp.maximum(out + res, 0.0)


if __name__ == "__main__":
    # Shapes consistent with TemporalBlock(n_inputs=4, n_outputs=8,
    # kernel_size=3, stride=1, dilation=2, padding=(3-1)*2=4).
    N, C_IN, C_OUT, L = 2, 4, 8, 16
    K, DIL = 3, 2
    PAD = (K - 1) * DIL

    key = jax.random.PRNGKey(0)
    kx, kp = jax.random.split(key)
    x = jax.random.normal(kx, (N, C_IN, L), jnp.float32)
    params = make_params(kp, C_IN, C_OUT, K)

    out = temporal_block(x, params, kernel_size=K, dilation=DIL, padding=PAD)
    out = jax.block_until_ready(out)

    ref = jax.block_until_ready(
        ref_temporal_block(x, params, kernel_size=K, dilation=DIL, padding=PAD))

    assert out.shape == (N, C_OUT, L), out.shape
    assert jnp.allclose(out, ref, rtol=1e-3, atol=1e-4), float(jnp.max(jnp.abs(out - ref)))
    print("KERNEL_OK")
</pallas_src>

<mosaic_0001>
module attributes {stable_mosaic.version = 11 : i64} {
  func.func @temporal_block_kernel(%arg0: i32, %arg1: memref<4x128xf32, #tpu.memory_space<vmem>>, %arg2: memref<1x128xi32, #tpu.memory_space<vmem>>, %arg3: memref<3x8x4xf32, #tpu.memory_space<vmem>>, %arg4: memref<8x1xf32, #tpu.memory_space<vmem>>, %arg5: memref<3x8x8xf32, #tpu.memory_space<vmem>>, %arg6: memref<8x1xf32, #tpu.memory_space<vmem>>, %arg7: memref<8x4xf32, #tpu.memory_space<vmem>>, %arg8: memref<8x1xf32, #tpu.memory_space<vmem>>, %arg9: memref<8x128xf32, #tpu.memory_space<vmem>>) attributes {dimension_semantics = [#tpu.dimension_semantics<parallel>], iteration_bounds = array<i64: 1>, scalar_prefetch = 0 : i64, scratch_operands = 0 : i64, tpu.core_type = #tpu.core_type<tc>, window_params = [{transform_indices = @transform_0, window_bounds = array<i64: 4, 128>}, {transform_indices = @transform_1, window_bounds = array<i64: 1, 128>}, {pipeline_mode = #tpu.pipeline_mode<synchronous>, transform_indices = @transform_2, window_bounds = array<i64: 3, 8, 4>}, {pipeline_mode = #tpu.pipeline_mode<synchronous>, transform_indices = @transform_3, window_bounds = array<i64: 8, 1>}, {pipeline_mode = #tpu.pipeline_mode<synchronous>, transform_indices = @transform_4, window_bounds = array<i64: 3, 8, 8>}, {pipeline_mode = #tpu.pipeline_mode<synchronous>, transform_indices = @transform_5, window_bounds = array<i64: 8, 1>}, {pipeline_mode = #tpu.pipeline_mode<synchronous>, transform_indices = @transform_6, window_bounds = array<i64: 8, 4>}, {pipeline_mode = #tpu.pipeline_mode<synchronous>, transform_indices = @transform_7, window_bounds = array<i64: 8, 1>}, {transform_indices = @transform_8, window_bounds = array<i64: 8, 128>}]} {
    %c0 = arith.constant 0 : index
    %c0_0 = arith.constant 0 : index
    %0 = vector.load %arg2[%c0, %c0_0] : memref<1x128xi32, #tpu.memory_space<vmem>>, vector<1x128xi32>
    %c4_i32 = arith.constant 4 : i32
    %1 = vector.broadcast %c4_i32 : i32 to vector<1x128xi32>
    %2 = arith.cmpi sge, %0, %1 : vector<1x128xi32>
    %c2_i32 = arith.constant 2 : i32
    %3 = vector.broadcast %c2_i32 : i32 to vector<1x128xi32>
    %4 = arith.cmpi sge, %0, %3 : vector<1x128xi32>
    %c0_1 = arith.constant 0 : index
    %c0_2 = arith.constant 0 : index
    %5 = vector.load %arg1[%c0_1, %c0_2] : memref<4x128xf32, #tpu.memory_space<vmem>>, vector<4x128xf32>
    %c4_i32_3 = arith.constant 4 : i32
    %6 = tpu.dynamic_rotate %5 by %c4_i32_3 dim 1 : vector<4x128xf32>, i32 -> vector<4x128xf32>
    %cst = arith.constant 0.000000e+00 : f32
    %7 = vector.shape_cast %2 : vector<1x128xi1> to vector<1x128xi1>
    %8 = vector.broadcast %7 : vector<1x128xi1> to vector<4x128xi1>
    %9 = vector.broadcast %cst : f32 to vector<4x128xf32>
    %10 = arith.select %8, %6, %9 : vector<4x128xi1>, vector<4x128xf32>
    %c0_4 = arith.constant 0 : index
    %c0_5 = arith.constant 0 : index
    %c0_6 = arith.constant 0 : index
    %11 = vector.load %arg3[%c0_4, %c0_5, %c0_6] : memref<3x8x4xf32, #tpu.memory_space<vmem>>, vector<1x8x4xf32>
    %12 = vector.shape_cast %11 : vector<1x8x4xf32> to vector<8x4xf32>
    %cst_7 = arith.constant dense<0.000000e+00> : vector<8x128xf32>
    %13 = tpu.matmul %12, %10, %cst_7 {dimension_numbers = #tpu.dot_dimension_numbers<[1], [0], [0], [1], [0, 0, 1, 1], [], []>} : vector<8x4xf32>, vector<4x128xf32>, vector<8x128xf32> -> vector<8x128xf32>
    %c2_i32_8 = arith.constant 2 : i32
    %14 = tpu.dynamic_rotate %5 by %c2_i32_8 dim 1 : vector<4x128xf32>, i32 -> vector<4x128xf32>
    %cst_9 = arith.constant 0.000000e+00 : f32
    %15 = vector.shape_cast %4 : vector<1x128xi1> to vector<1x128xi1>
    %16 = vector.broadcast %15 : vector<1x128xi1> to vector<4x128xi1>
    %17 = vector.broadcast %cst_9 : f32 to vector<4x128xf32>
    %18 = arith.select %16, %14, %17 : vector<4x128xi1>, vector<4x128xf32>
    %c1 = arith.constant 1 : index
    %c0_10 = arith.constant 0 : index
    %c0_11 = arith.constant 0 : index
    %19 = vector.load %arg3[%c1, %c0_10, %c0_11] : memref<3x8x4xf32, #tpu.memory_space<vmem>>, vector<1x8x4xf32>
    %20 = vector.shape_cast %19 : vector<1x8x4xf32> to vector<8x4xf32>
    %cst_12 = arith.constant dense<0.000000e+00> : vector<8x128xf32>
    %21 = tpu.matmul %20, %18, %cst_12 {dimension_numbers = #tpu.dot_dimension_numbers<[1], [0], [0], [1], [0, 0, 1, 1], [], []>} : vector<8x4xf32>, vector<4x128xf32>, vector<8x128xf32> -> vector<8x128xf32>
    %22 = arith.addf %13, %21 : vector<8x128xf32>
    %c2 = arith.constant 2 : index
    %c0_13 = arith.constant 0 : index
    %c0_14 = arith.constant 0 : index
    %23 = vector.load %arg3[%c2, %c0_13, %c0_14] : memref<3x8x4xf32, #tpu.memory_space<vmem>>, vector<1x8x4xf32>
    %24 = vector.shape_cast %23 : vector<1x8x4xf32> to vector<8x4xf32>
    %cst_15 = arith.constant dense<0.000000e+00> : vector<8x128xf32>
    %25 = tpu.matmul %24, %5, %cst_15 {dimension_numbers = #tpu.dot_dimension_numbers<[1], [0], [0], [1], [0, 0, 1, 1], [], []>} : vector<8x4xf32>, vector<4x128xf32>, vector<8x128xf32> -> vector<8x128xf32>
    %26 = arith.addf %22, %25 : vector<8x128xf32>
    %c0_16 = arith.constant 0 : index
    %c0_17 = arith.constant 0 : index
    %27 = vector.load %arg4[%c0_16, %c0_17] : memref<8x1xf32, #tpu.memory_space<vmem>>, vector<8x1xf32>
    %28 = vector.broadcast %27 : vector<8x1xf32> to vector<8x128xf32>
    %29 = arith.addf %26, %28 : vector<8x128xf32>
    %cst_18 = arith.constant 0.000000e+00 : f32
    %30 = vector.broadcast %cst_18 : f32 to vector<8x128xf32>
    %31 = arith.maximumf %29, %30 : vector<8x128xf32>
    %c4_i32_19 = arith.constant 4 : i32
    %32 = tpu.dynamic_rotate %31 by %c4_i32_19 dim 1 : vector<8x128xf32>, i32 -> vector<8x128xf32>
    %cst_20 = arith.constant 0.000000e+00 : f32
    %33 = vector.shape_cast %2 : vector<1x128xi1> to vector<1x128xi1>
    %34 = vector.broadcast %33 : vector<1x128xi1> to vector<8x128xi1>
    %35 = vector.broadcast %cst_20 : f32 to vector<8x128xf32>
    %36 = arith.select %34, %32, %35 : vector<8x128xi1>, vector<8x128xf32>
    %c0_21 = arith.constant 0 : index
    %c0_22 = arith.constant 0 : index
    %c0_23 = arith.constant 0 : index
    %37 = vector.load %arg5[%c0_21, %c0_22, %c0_23] : memref<3x8x8xf32, #tpu.memory_space<vmem>>, vector<1x8x8xf32>
    %38 = vector.shape_cast %37 : vector<1x8x8xf32> to vector<8x8xf32>
    %cst_24 = arith.constant dense<0.000000e+00> : vector<8x128xf32>
    %39 = tpu.matmul %38, %36, %cst_24 {dimension_numbers = #tpu.dot_dimension_numbers<[1], [0], [0], [1], [0, 0, 1, 1], [], []>} : vector<8x8xf32>, vector<8x128xf32>, vector<8x128xf32> -> vector<8x128xf32>
    %c2_i32_25 = arith.constant 2 : i32
    %40 = tpu.dynamic_rotate %31 by %c2_i32_25 dim 1 : vector<8x128xf32>, i32 -> vector<8x128xf32>
    %cst_26 = arith.constant 0.000000e+00 : f32
    %41 = vector.shape_cast %4 : vector<1x128xi1> to vector<1x128xi1>
    %42 = vector.broadcast %41 : vector<1x128xi1> to vector<8x128xi1>
    %43 = vector.broadcast %cst_26 : f32 to vector<8x128xf32>
    %44 = arith.select %42, %40, %43 : vector<8x128xi1>, vector<8x128xf32>
    %c1_27 = arith.constant 1 : index
    %c0_28 = arith.constant 0 : index
    %c0_29 = arith.constant 0 : index
    %45 = vector.load %arg5[%c1_27, %c0_28, %c0_29] : memref<3x8x8xf32, #tpu.memory_space<vmem>>, vector<1x8x8xf32>
    %46 = vector.shape_cast %45 : vector<1x8x8xf32> to vector<8x8xf32>
    %cst_30 = arith.constant dense<0.000000e+00> : vector<8x128xf32>
    %47 = tpu.matmul %46, %44, %cst_30 {dimension_numbers = #tpu.dot_dimension_numbers<[1], [0], [0], [1], [0, 0, 1, 1], [], []>} : vector<8x8xf32>, vector<8x128xf32>, vector<8x128xf32> -> vector<8x128xf32>
    %48 = arith.addf %39, %47 : vector<8x128xf32>
    %c2_31 = arith.constant 2 : index
    %c0_32 = arith.constant 0 : index
    %c0_33 = arith.constant 0 : index
    %49 = vector.load %arg5[%c2_31, %c0_32, %c0_33] : memref<3x8x8xf32, #tpu.memory_space<vmem>>, vector<1x8x8xf32>
    %50 = vector.shape_cast %49 : vector<1x8x8xf32> to vector<8x8xf32>
    %cst_34 = arith.constant dense<0.000000e+00> : vector<8x128xf32>
    %51 = tpu.matmul %50, %31, %cst_34 {dimension_numbers = #tpu.dot_dimension_numbers<[1], [0], [0], [1], [0, 0, 1, 1], [], []>} : vector<8x8xf32>, vector<8x128xf32>, vector<8x128xf32> -> vector<8x128xf32>
    %52 = arith.addf %48, %51 : vector<8x128xf32>
    %c0_35 = arith.constant 0 : index
    %c0_36 = arith.constant 0 : index
    %53 = vector.load %arg6[%c0_35, %c0_36] : memref<8x1xf32, #tpu.memory_space<vmem>>, vector<8x1xf32>
    %54 = vector.broadcast %53 : vector<8x1xf32> to vector<8x128xf32>
    %55 = arith.addf %52, %54 : vector<8x128xf32>
    %cst_37 = arith.constant 0.000000e+00 : f32
    %56 = vector.broadcast %cst_37 : f32 to vector<8x128xf32>
    %57 = arith.maximumf %55, %56 : vector<8x128xf32>
    %c0_38 = arith.constant 0 : index
    %c0_39 = arith.constant 0 : index
    %58 = vector.load %arg7[%c0_38, %c0_39] : memref<8x4xf32, #tpu.memory_space<vmem>>, vector<8x4xf32>
    %cst_40 = arith.constant dense<0.000000e+00> : vector<8x128xf32>
    %59 = tpu.matmul %58, %5, %cst_40 {dimension_numbers = #tpu.dot_dimension_numbers<[1], [0], [0], [1], [0, 0, 1, 1], [], []>} : vector<8x4xf32>, vector<4x128xf32>, vector<8x128xf32> -> vector<8x128xf32>
    %c0_41 = arith.constant 0 : index
    %c0_42 = arith.constant 0 : index
    %60 = vector.load %arg8[%c0_41, %c0_42] : memref<8x1xf32, #tpu.memory_space<vmem>>, vector<8x1xf32>
    %61 = vector.broadcast %60 : vector<8x1xf32> to vector<8x128xf32>
    %62 = arith.addf %59, %61 : vector<8x128xf32>
    %63 = arith.addf %57, %62 : vector<8x128xf32>
    %cst_43 = arith.constant 0.000000e+00 : f32
    %64 = vector.broadcast %cst_43 : f32 to vector<8x128xf32>
    %65 = arith.maximumf %63, %64 : vector<8x128xf32>
    %c0_44 = arith.constant 0 : index
    %c0_45 = arith.constant 0 : index
    %66 = vector.load %arg9[%c0_44, %c0_45] : memref<8x128xf32, #tpu.memory_space<vmem>>, vector<8x128xf32>
    tpu.vector_store %arg9[%c0_44, %c0_45], %65 {strides = array<i32>} : memref<8x128xf32, #tpu.memory_space<vmem>>, vector<8x128xf32>,
    return
  }
  func.func @transform_0(%arg0: i32) -> (i32, i32) {
    %c0_i32 = arith.constant 0 : i32
    %c0_i32_0 = arith.constant 0 : i32
    return %c0_i32, %arg0 : i32, i32
  }
  func.func @transform_1(%arg0: i32) -> (i32, i32) {
    %c0_i32 = arith.constant 0 : i32
    %c0_i32_0 = arith.constant 0 : i32
    return %c0_i32, %arg0 : i32, i32
  }
  func.func @transform_2(%arg0: i32) -> (i32, i32, i32) {
    %c0_i32 = arith.constant 0 : i32
    %c0_i32_0 = arith.constant 0 : i32
    %c0_i32_1 = arith.constant 0 : i32
    %c0_i32_2 = arith.constant 0 : i32
    return %c0_i32, %c0_i32_0, %c0_i32_1 : i32, i32, i32
  }
  func.func @transform_3(%arg0: i32) -> (i32, i32) {
    %c0_i32 = arith.constant 0 : i32
    %c0_i32_0 = arith.constant 0 : i32
    %c0_i32_1 = arith.constant 0 : i32
    return %c0_i32, %c0_i32_0 : i32, i32
  }
  func.func @transform_4(%arg0: i32) -> (i32, i32, i32) {
    %c0_i32 = arith.constant 0 : i32
    %c0_i32_0 = arith.constant 0 : i32
    %c0_i32_1 = arith.constant 0 : i32
    %c0_i32_2 = arith.constant 0 : i32
    return %c0_i32, %c0_i32_0, %c0_i32_1 : i32, i32, i32
  }
  func.func @transform_5(%arg0: i32) -> (i32, i32) {
    %c0_i32 = arith.constant 0 : i32
    %c0_i32_0 = arith.constant 0 : i32
    %c0_i32_1 = arith.constant 0 : i32
    return %c0_i32, %c0_i32_0 : i32, i32
  }
  func.func @transform_6(%arg0: i32) -> (i32, i32) {
    %c0_i32 = arith.constant 0 : i32
    %c0_i32_0 = arith.constant 0 : i32
    %c0_i32_1 = arith.constant 0 : i32
    return %c0_i32, %c0_i32_0 : i32, i32
  }
  func.func @transform_7(%arg0: i32) -> (i32, i32) {
    %c0_i32 = arith.constant 0 : i32
    %c0_i32_0 = arith.constant 0 : i32
    %c0_i32_1 = arith.constant 0 : i32
    return %c0_i32, %c0_i32_0 : i32, i32
  }
  func.func @transform_8(%arg0: i32) -> (i32, i32) {
    %c0_i32 = arith.constant 0 : i32
    %c0_i32_0 = arith.constant 0 : i32
    return %c0_i32, %arg0 : i32, i32
  }
}

</mosaic_0001>

<bundles_post_ra>
// kernel: tpu_custom_call.1
= control target key start
LH: loop header
LB: loop body
LE: loop exit
PB: predicated region body
PF: predicated region fallthrough
CT: control target
= control target key end

     0   :  { %s731_s29 = smov 2   ;;  %v732_v1 = vmov 0.0   ;;  %vm733_vm0 = vmmov 0   ;;  %v734_v3 = vmov 0   ;;  %s876_s0 = inlined_call_operand.vmem [shape: f32[4,128], index: 0, kind: input, shape index: {}]   ;;  %s877_s1 = inlined_call_operand.vmem [shape: s32[1,128], index: 1, kind: input, shape index: {}]   ;;  %s878_s2 = inlined_call_operand.vmem [shape: f32[3,8,4], index: 2, kind: input, shape index: {}]   ;;  %s879_s3 = inlined_call_operand.vmem [shape: f32[8,1], index: 3, kind: input, shape index: {}]   ;;  %s880_s4 = inlined_call_operand.vmem [shape: f32[3,8,8], index: 4, kind: input, shape index: {}]   ;;  %s881_s5 = inlined_call_operand.vmem [shape: f32[8,1], index: 5, kind: input, shape index: {}]   ;;  %s882_s6 = inlined_call_operand.vmem [shape: f32[8,4], index: 6, kind: input, shape index: {}]   ;;  %s883_s7 = inlined_call_operand.vmem [shape: f32[8,1], index: 7, kind: input, shape index: {}]   ;;  %s884_s8 = inlined_call_operand.hbm [shape: f32[8,128], index: 8, kind: output, shape index: {}]  }
   0x1   :  { %v785_v0 = vld [vmem:[%s876_s0] sm:$0xf]  ;;  %664 = vmatprep.subr.mxu0 %v732_v1  ;;  %666 = vmatprep.mubr.msk.f32.mxu0 %vm733_vm0, %v732_v1 }
   0x2   :  { %44 = vrot.lane.b32.xlu0 %v785_v0, %s731_s29  ;;  %669 = vmatprep.subr.mxu1 %v732_v1  ;;  %v288_v2 = vld [vmem:[%s879_s3] sm:$0xff] }
   0x3   :  { %671 = vmatprep.mubr.msk.f32.mxu1 %vm733_vm0, %v732_v1  ;;  %705 = vset.pattern.permute.xlu1 %v734_v3 }
   0x4   :  { %13 = vsyncpa [#allocation3], 0  ;;  %291 = vperm.xlu1 %705, %v288_v2   ;;  %706 = vset.pattern.permute.xlu0 %v734_v3  ;;  %s735_s0 = smov 4   ;;  %v37_v4 = vlaneseq  ;;  %v30_v5 = vld [vmem:[%s877_s1] sm:$0x1]  ;;  %vm59_vm4 = vcmask 1043456  }
   0x5   :  { %vm32_vm1 = vcmp.ge.s32.totalorder %v30_v5, 2  ;;  %vm31_vm2 = vcmp.ge.s32.totalorder %v30_v5, 4  ;;  %v633_v13 = vld [vmem:[%s878_s2 + $0x8] sm:$0xff]  ;;  %vm55_vm5 = vcmask 31744   ;;  %v43_v16 = vld [vmem:[%s878_s2] sm:$0xff]  ;;  %v638_v17 = vld [vmem:[%s878_s2 + $0x10] sm:$0xff] }
   0x6   :  { %34 = vrot.lane.b32.xlu0 %v785_v0, %s735_s0  ;;  %v38_v6 = vshrl.u32 %v37_v4, 7  ;;  %v46_v8 = vsel %vm32_vm1, 1, %v734_v3  ;;  %v36_v10 = vsel %vm31_vm2, 1, %v734_v3  ;;  %v528_v30 = vld [vmem:[%s881_s5] sm:$0xff]  ;;  %v641_v32 = vld [vmem:[%s880_s4 + $0x8] sm:$0xff]  ;;  %vm305_vm7 = vcmask 64512  }
   0x7   :  { %v537_v31 = vld [vmem:[%s883_s7] sm:$0xff]  ;;  %v646_v36 = vld [vmem:[%s880_s4 + $0x10] sm:$0xff] }
   0x8   :  { %v39_v7 = vsub.s32 0, %v38_v6  ;;  %v299_v35 = vld [vmem:[%s880_s4] sm:$0xff]  ;;  %s736_s4 = smov [#allocation2]  }
   0x9   :  { %v536_v37 = vld [vmem:[%s882_s6] sm:$0xff]  ;;  %s625_s6 = sshll.u32 %s736_s4, 4  ;;  %s626_s6 = int_to_ptr.vmem [resolvable:$true] %s625_s6 }
   0xa   :  { %v50_v9 = vrot.slane %v46_v8, %v39_v7  ;;  %v40_v11 = vrot.slane %v36_v10, %v39_v7  ;;  %s707_s25 = scalar_lea.vmem %s626_s6, 128  ;;  %p712_p1 = scmp.lt.s32.totalorder %s626_s6, %s626_s6 }
   0xb   :  { %p708_p0 = scmp.ne.s32.totalorder %s626_s6, %s707_s25  ;;  %p713_p2 = scmp.lt.s32.totalorder %s707_s25, %s707_s25 }
   0xc   :  { %vm51_vm3 = vcmp.eq.s32.totalorder %v50_v9, 1  ;;  %vm41_vm6 = vcmp.eq.s32.totalorder %v40_v11, 1 }
   0xd   :  { %p714_p3 = por %p713_p2, %p712_p1 }
   0xf   :  { %p715_p4 = pnand %p714_p3, %p708_p0 }
  0x74   :  { %v45_v12 = vpop.permute.xlu0 %44 }
  0x75   :  { %v52_v14 = vsel %vm51_vm3, %v45_v12, 0.0 }
  0x76   :  { %665 = vmatpush3.msk.msra.mxu0 %vm59_vm4, %v52_v14 }
  0x77   :  { %667 = vmatmul.mubr.msk.f32.vlgmr.msra.gmra.mrb[0].mxu0 %vm55_vm5, %v633_v13  ;;  %674 = vmatprep.subr.mxu0 %v732_v1 }
  0x78   :  { %v35_v15 = vpop.permute.xlu0 %34  ;;  %675 = vmatpush3.msk.msra.mxu0 %vm59_vm4, %v785_v0  ;;  %676 = vmatprep.mubr.msk.f32.mxu0 %vm733_vm0, %v732_v1 }
  0x79   :  { %v42_v18 = vsel %vm41_vm6, %v35_v15, 0.0  ;;  %684 = vmatprep.subr.mxu0 %v732_v1 }
  0x7a   :  { %670 = vmatpush3.msk.msra.mxu1 %vm59_vm4, %v42_v18 }
  0x7b   :  { %672 = vmatmul.mubr.msk.f32.vlgmr.msra.gmra.mrb[0].mxu1 %vm55_vm5, %v43_v16  ;;  %677 = vmatmul.mubr.msk.f32.vlgmr.msra.gmra.mrb[2].mxu0 %vm55_vm5, %v638_v17 }
  0x7c   :  { %679 = vmatprep.subr.mxu1 %v732_v1  ;;  %681 = vmatprep.mubr.msk.f32.mxu1 %vm733_vm0, %v732_v1 }
  0x7d   :  { %686 = vmatprep.mubr.msk.f32.mxu0 %vm733_vm0, %v732_v1 }
  0x83   :  { %v292_v26 = vpop.permute.xlu1 %291 }
 0x14a   :  { %v129_v19 = vpop.f32.mrb[0].mxu0 }
 0x14b   :  { %v668_v20 = vpop.f32.mrb[1].mxu0 }
 0x14e   :  { %v205_v21 = vpop.f32.mrb[0].mxu1  ;;  %v283_v22 = vpop.f32.mrb[2].mxu0 }
 0x14f   :  { %v206_v23 = vadd.f32 %v205_v21, %v129_v19  ;;  %v673_v24 = vpop.f32.mrb[1].mxu1  ;;  %v678_v25 = vpop.f32.mrb[3].mxu0 }
 0x151   :  { %v287_v27 = vadd.f32 %v283_v22, %v206_v23 }
 0x153   :  { %v294_v28 = vadd.f32 %v292_v26, %v287_v27 }
 0x155   :  { %v295_v29 = vmax.f32 %v294_v28, 0.0 }
 0x157   :  { %296 = vrot.lane.b32.xlu0 %v295_v29, %s735_s0  ;;  %300 = vrot.lane.b32.xlu1 %v295_v29, %s731_s29 }
 0x15b   :  { %531 = vperm.xlu1 %705, %v528_v30   ;;  %540 = vperm.xlu0 %706, %v537_v31  }
 0x1c9   :  { %v297_v33 = vpop.permute.xlu0 %296  ;;  %v301_v34 = vpop.permute.xlu1 %300 }
 0x1ca   :  { %680 = vmatpush3.msk.msra.mxu1 %vm51_vm3, %v301_v34  ;;  %685 = vmatpush3.msk.msra.mxu0 %vm41_vm6, %v297_v33 }
 0x1cb   :  { %682 = vmatmul.mubr.msk.f32.vlgmr.msra.gmra.mrb[2].mxu1 %vm305_vm7, %v641_v32  ;;  %689 = vmatprep.subr.mxu1 %v732_v1 }
 0x1cc   :  { %690 = vmatpush3.msra.mxu1 %v295_v29  ;;  %687 = vmatmul.mubr.msk.f32.vlgmr.msra.gmra.mrb[4].mxu0 %vm305_vm7, %v299_v35 }
 0x1cd   :  { %691 = vmatprep.mubr.msk.f32.mxu1 %vm733_vm0, %v732_v1  ;;  %694 = vmatprep.subr.mxu0 %v732_v1 }
 0x1ce   :  { %695 = vmatpush3.msk.msra.mxu0 %vm59_vm4, %v785_v0  ;;  %696 = vmatprep.mubr.msk.f32.mxu0 %vm733_vm0, %v732_v1 }
 0x1cf   :  { %692 = vmatmul.mubr.msk.f32.vlgmr.msra.gmra.mrb[4].mxu1 %vm305_vm7, %v646_v36 }
 0x1d0   :  { %697 = vmatmul.mubr.msk.f32.vlgmr.msra.gmra.mrb[6].mxu0 %vm55_vm5, %v536_v37 }
 0x1da   :  { %v541_v44 = vpop.permute.xlu0 %540  ;;  %v532_v48 = vpop.permute.xlu1 %531 }
 0x29e   :  { %v375_v38 = vpop.f32.mrb[2].mxu1 }
 0x29f   :  { %v448_v39 = vpop.f32.mrb[4].mxu0  ;;  %v683_v40 = vpop.f32.mrb[3].mxu1 }
 0x2a0   :  { %v449_v41 = vadd.f32 %v448_v39, %v375_v38  ;;  %v688_v42 = vpop.f32.mrb[5].mxu0 }
 0x2a2   :  { %v523_v43 = vpop.f32.mrb[4].mxu1 }
 0x2a3   :  { %v527_v45 = vadd.f32 %v523_v43, %v449_v41  ;;  %v693_v46 = vpop.f32.mrb[5].mxu1  ;;  %v612_v47 = vpop.f32.mrb[6].mxu0 }
 0x2a4   :  { %v698_v49 = vpop.f32.mrb[7].mxu0  ;;  %v613_v51 = vadd.f32 %v612_v47, %v541_v44 }
 0x2a5   :  { %v534_v50 = vadd.f32 %v532_v48, %v527_v45 }
 0x2a7   :  { %v535_v52 = vmax.f32 %v534_v50, 0.0 }
 0x2a9   :  { %v616_v53 = vadd.f32 %v613_v51, %v535_v52 }
 0x2ab   :  { %v617_v54 = vmax.f32 %v616_v53, 0.0 }
 0x2ad   :  { %618 = vst [vmem:[#allocation2] sm:$0xff] %v617_v54 }
 0x2ae   :  { %718 = shalt.err (!%p715_p4)
}
 0x2af   :  { %s719_s28 = scalar_lea.hbm %s884_s8, 128 }
 0x2b0   :  { %p720_p5 = scmp.ne.s32.totalorder %s884_s8, %s719_s28  ;;  %p723_p6 = scmp.lt.u32.totalorder %s719_s28, %s884_s8 }
 0x2b2   :  { %p725_p7 = pnand %p723_p6, %p720_p5 }
 0x2b4   :  { %728 = shalt.err (!%p725_p7)
}
 0x2b5   :  { %628 = dma.vmem_to_hbm [thread:$0]  %s626_s6, 128, %s884_s8, [#allocation3]  }
 0x2b6   :  { %729 = dma.done.wait [#allocation3], 128  }
 0x2b7   :  { %730 = vsyncadd [#allocation3], 4294967168 }
 0x2b8   :  { %632 = vsyncpa [#allocation3], 1 }

</bundles_post_ra>
